<compile_context>
chip_gen: v7x
topology: tpu7x:2x2x1
jax: 0.10.0
libtpu: 0.0.40
codegen_flags: <defaults>
</compile_context>

<pallas_src>
import functools

import jax
import jax.numpy as jnp
import numpy as np
from jax.experimental import pallas as pl
from jax.experimental.pallas import tpu as pltpu


# ---------------------------------------------------------------------------
# Pallas kernel
# ---------------------------------------------------------------------------
def _loss_kernel(pred_ref, gt_ref, anc_ref, out_ref,
                 acc_nobj, acc_cls, acc_pos, acc_neg, acc_bbox, *,
                 num_classes, num_anchors, input_w, input_h,
                 w_cls, w_pos, w_neg, w_bbox):
    k = pl.program_id(1)
    nk = pl.num_programs(1)
    nc = num_classes

    @pl.when(k == 0)
    def _zero():
        acc_nobj[...] = jnp.zeros_like(acc_nobj)
        acc_cls[...] = jnp.zeros_like(acc_cls)
        acc_pos[...] = jnp.zeros_like(acc_pos)
        acc_neg[...] = jnp.zeros_like(acc_neg)
        acc_bbox[...] = jnp.zeros_like(acc_bbox)

    # Channels on sublanes, anchors on lanes.
    pred = pred_ref[...].astype(jnp.float32)     # (Cp, TA)
    gt = gt_ref[...].astype(jnp.float32)         # (Cg, TA)
    anc = anc_ref[...].astype(jnp.float32)       # (4,  TA)

    # ----- ground-truth split -----
    mask = gt[0:1, :]                            # (1, TA)
    gxmin, gymin = gt[1:2, :], gt[2:3, :]
    gxmax, gymax = gt[3:4, :], gt[4:5, :]
    gt_deltas = gt[5:9, :]                       # (4, TA)
    gt_cls = gt[9:, :]                           # (nc, TA)

    # ----- prediction split -----
    cls_logits = pred[0:nc, :]                   # (nc, TA)
    score_logit = pred[nc:nc + 1, :]             # (1, TA)
    deltas = pred[nc + 1:, :]                    # (4, TA)

    # ----- log-softmax over classes (sublane reduction), using the identity
    #       sum_c gt_c * (-log p_c) = (sum_c gt_c) * lse - sum_c gt_c*shifted_c
    m = jnp.max(cls_logits, axis=0, keepdims=True)
    shifted = cls_logits - m
    lse = jnp.log(jnp.sum(jnp.exp(shifted), axis=0, keepdims=True))
    gt_cls_sum = jnp.sum(gt_cls, axis=0, keepdims=True)
    gt_dot = jnp.sum(gt_cls * shifted, axis=0, keepdims=True)
    class_term = mask * (gt_cls_sum * lse - gt_dot)          # (1, TA)

    pred_scores = jax.nn.sigmoid(score_logit)                # (1, TA)

    # ----- deltas_to_boxes -----
    anc_cx, anc_cy = anc[0:1, :], anc[1:2, :]
    anc_w, anc_h = anc[2:3, :], anc[3:4, :]
    box_cx = anc_cx + deltas[0:1, :] * anc_w
    box_cy = anc_cy + deltas[1:2, :] * anc_h
    box_w = anc_w * jnp.exp(deltas[2:3, :])
    box_h = anc_h * jnp.exp(deltas[3:4, :])
    xmin = jnp.clip(box_cx - 0.5 * box_w, 0.0, input_w - 1.0)
    ymin = jnp.clip(box_cy - 0.5 * box_h, 0.0, input_h - 1.0)
    xmax = jnp.clip(box_cx + 0.5 * box_w, 0.0, input_w - 1.0)
    ymax = jnp.clip(box_cy + 0.5 * box_h, 0.0, input_h - 1.0)

    # ----- IoU -----
    iw = jnp.maximum(jnp.minimum(gxmax, xmax) - jnp.maximum(gxmin, xmin), 0.0)
    ih = jnp.maximum(jnp.minimum(gymax, ymax) - jnp.maximum(gymin, ymin), 0.0)
    inter = iw * ih
    union = ((gxmax - gxmin) * (gymax - gymin)
             + (xmax - xmin) * (ymax - ymin) - inter)
    iou = inter / (union + 1e-10)

    overlaps = iou * mask
    score_sq = (overlaps - pred_scores) ** 2                 # (1, TA)
    bbox_term = jnp.sum(mask * (deltas - gt_deltas) ** 2,
                        axis=0, keepdims=True)               # (1, TA)

    # ----- lane-parallel accumulation across anchor tiles -----
    acc_nobj[...] += mask
    acc_cls[...] += class_term
    acc_pos[...] += mask * score_sq
    acc_neg[...] += (1.0 - mask) * score_sq
    acc_bbox[...] += bbox_term

    # ----- finalize: normalize and pack the 4 results into one (1, 4) row -----
    @pl.when(k == nk - 1)
    def _finalize():
        n_obj = jnp.sum(acc_nobj[...], axis=1, keepdims=True)         # (1, 1)
        class_loss = w_cls * jnp.sum(acc_cls[...], axis=1, keepdims=True) / n_obj
        pos_loss = w_pos * jnp.sum(acc_pos[...], axis=1, keepdims=True) / n_obj
        neg_loss = (w_neg * jnp.sum(acc_neg[...], axis=1, keepdims=True)
                    / (num_anchors - n_obj))
        bbox_loss = w_bbox * jnp.sum(acc_bbox[...], axis=1, keepdims=True) / n_obj
        score_loss = pos_loss + neg_loss
        loss = class_loss + score_loss + bbox_loss

        lane = jax.lax.broadcasted_iota(jnp.int32, (1, 4), 1)
        out_ref[...] = jnp.where(lane == 0, loss,
                        jnp.where(lane == 1, class_loss,
                         jnp.where(lane == 2, score_loss, bbox_loss)))


# ---------------------------------------------------------------------------
# Wrapper
# ---------------------------------------------------------------------------
def _pick_anchor_tile(A, max_tile):
    """Largest multiple of 128 that divides A and is <= max_tile; else A."""
    if A % 128 != 0:
        # No 128-multiple divisor exists -> single full-extent tile.
        return A
    ta = min(max_tile, A)
    ta -= ta % 128
    ta = max(ta, 128)
    while A % ta != 0:
        ta -= 128
    return ta


def squeezedet_loss(pred, gt, anchors, *, num_classes, input_size,
                    class_loss_weight=1.0, positive_score_loss_weight=3.75,
                    negative_score_loss_weight=100.0, bbox_loss_weight=6.0,
                    anchor_tile=2048):
    B, A, Cp = pred.shape
    Cg = gt.shape[-1]
    assert anchors.shape == (1, A, 4)
    assert Cp == num_classes + 5 and Cg == 9 + num_classes

    # Lane-dense layout: anchors on the lane axis, channels on sublanes.
    pred_t = jnp.transpose(pred, (0, 2, 1))          # (B, Cp, A)
    gt_t = jnp.transpose(gt, (0, 2, 1))              # (B, Cg, A)
    anc_t = jnp.transpose(anchors[0], (1, 0))        # (4, A)

    TA = _pick_anchor_tile(A, anchor_tile)
    assert A % TA == 0
    nk = A // TA

    kernel = functools.partial(
        _loss_kernel,
        num_classes=num_classes, num_anchors=A,
        input_w=float(input_size[0]), input_h=float(input_size[1]),
        w_cls=float(class_loss_weight), w_pos=float(positive_score_loss_weight),
        w_neg=float(negative_score_loss_weight), w_bbox=float(bbox_loss_weight))

    _CompilerParams = getattr(pltpu, "CompilerParams", None) or getattr(
        pltpu, "TPUCompilerParams")

    out = pl.pallas_call(
        kernel,
        grid=(B, nk),
        in_specs=[
            pl.BlockSpec((None, Cp, TA), lambda b, k: (b, 0, k)),
            pl.BlockSpec((None, Cg, TA), lambda b, k: (b, 0, k)),
            pl.BlockSpec((4, TA), lambda b, k: (0, k)),
        ],
        out_specs=pl.BlockSpec((None, 1, 4), lambda b, k: (b, 0, 0)),
        out_shape=jax.ShapeDtypeStruct((B, 1, 4), jnp.float32),
        scratch_shapes=[pltpu.VMEM((1, TA), jnp.float32) for _ in range(5)],
        compiler_params=_CompilerParams(
            dimension_semantics=("parallel", "arbitrary")),
    )(pred_t, gt_t, anc_t)

    out = out[:, 0, :]                                # (B, 4)
    loss = out[:, 0]
    loss_stat = {'loss': loss, 'class_loss': out[:, 1],
                 'score_loss': out[:, 2], 'bbox_loss': out[:, 3]}
    return loss, loss_stat


# ---------------------------------------------------------------------------
# Pure-JAX reference (mirrors the PyTorch forward) for verification
# ---------------------------------------------------------------------------
def reference_loss(pred, gt, anchors, *, num_classes, num_anchors, input_size,
                   w_cls, w_pos, w_neg, w_bbox):
    nc = num_classes
    mask, gt_boxes, gt_deltas, gt_cls = gt[..., :1], gt[..., 1:5], gt[..., 5:9], gt[..., 9:]
    logp = jax.nn.log_softmax(pred[..., :nc], axis=-1)
    scores = jax.nn.sigmoid(pred[..., nc:nc + 1])
    deltas = pred[..., nc + 1:]
    cx = anchors[..., 0:1] + deltas[..., 0:1] * anchors[..., 2:3]
    cy = anchors[..., 1:2] + deltas[..., 1:2] * anchors[..., 3:4]
    w = anchors[..., 2:3] * jnp.exp(deltas[..., 2:3])
    h = anchors[..., 3:4] * jnp.exp(deltas[..., 3:4])
    xmin = jnp.clip(cx - 0.5 * w, 0, input_size[0] - 1)
    ymin = jnp.clip(cy - 0.5 * h, 0, input_size[1] - 1)
    xmax = jnp.clip(cx + 0.5 * w, 0, input_size[0] - 1)
    ymax = jnp.clip(cy + 0.5 * h, 0, input_size[1] - 1)
    iw = jnp.maximum(jnp.minimum(gt_boxes[..., 2:3], xmax) - jnp.maximum(gt_boxes[..., 0:1], xmin), 0)
    ih = jnp.maximum(jnp.minimum(gt_boxes[..., 3:4], ymax) - jnp.maximum(gt_boxes[..., 1:2], ymin), 0)
    inter = iw * ih
    union = ((gt_boxes[..., 2:3] - gt_boxes[..., 0:1]) * (gt_boxes[..., 3:4] - gt_boxes[..., 1:2])
             + (xmax - xmin) * (ymax - ymin) - inter)
    iou = inter / (union + 1e-10)
    n_obj = jnp.sum(mask, axis=(1, 2))
    ov = iou * mask
    cl = jnp.sum(w_cls * mask * gt_cls * (-logp), axis=(1, 2)) / n_obj
    pos = jnp.sum(w_pos * mask * (ov - scores) ** 2, axis=(1, 2)) / n_obj
    neg = jnp.sum(w_neg * (1 - mask) * (ov - scores) ** 2, axis=(1, 2)) / (num_anchors - n_obj)
    bb = jnp.sum(w_bbox * mask * (deltas - gt_deltas) ** 2, axis=(1, 2)) / n_obj
    return cl + pos + neg + bb, cl, pos + neg, bb


# ---------------------------------------------------------------------------
if __name__ == "__main__":
    B = 2
    num_classes = 3
    grid_h, grid_w, anchors_per_grid = 8, 8, 4
    A = grid_h * grid_w * anchors_per_grid            # num_anchors = 256
    input_size = (64, 64)                             # (W, H)
    Cp = num_classes + 1 + 4                          # 8
    Cg = 1 + 4 + 4 + num_classes                      # 12

    # Deterministic anchors (cx, cy, w, h) on an 8x8 grid, 4 sizes per cell.
    sizes = np.array([[12.0, 12.0], [20.0, 16.0], [16.0, 20.0], [24.0, 24.0]],
                     dtype=np.float32)
    anc = []
    for gy in range(grid_h):
        for gx in range(grid_w):
            for s in sizes:
                anc.append([(gx + 0.5) * input_size[0] / grid_w,
                            (gy + 0.5) * input_size[1] / grid_h, s[0], s[1]])
    anchors = jnp.asarray(np.asarray(anc, dtype=np.float32))[None]   # (1, A, 4)

    key = jax.random.PRNGKey(0)
    k_pred, k_mask, k_box, k_del, k_cls = jax.random.split(key, 5)

    pred = 0.5 * jax.random.normal(k_pred, (B, A, Cp), dtype=jnp.float32)

    mask = (jax.random.uniform(k_mask, (B, A, 1)) < 0.2).astype(jnp.float32)
    mask = mask.at[:, 0, 0].set(1.0)                  # ensure >= 1 object / image

    bcx = jax.random.uniform(k_box, (B, A, 1), minval=12.0, maxval=52.0)
    bcy = jax.random.uniform(jax.random.fold_in(k_box, 1), (B, A, 1), minval=12.0, maxval=52.0)
    bw = jax.random.uniform(jax.random.fold_in(k_box, 2), (B, A, 1), minval=8.0, maxval=22.0)
    bh = jax.random.uniform(jax.random.fold_in(k_box, 3), (B, A, 1), minval=8.0, maxval=22.0)
    gt_boxes = jnp.concatenate([
        jnp.clip(bcx - 0.5 * bw, 0, input_size[0] - 1),
        jnp.clip(bcy - 0.5 * bh, 0, input_size[1] - 1),
        jnp.clip(bcx + 0.5 * bw, 0, input_size[0] - 1),
        jnp.clip(bcy + 0.5 * bh, 0, input_size[1] - 1)], axis=-1)

    gt_deltas = 0.1 * jax.random.normal(k_del, (B, A, 4), dtype=jnp.float32)
    cls_ids = jax.random.randint(k_cls, (B, A), 0, num_classes)
    gt_cls = jax.nn.one_hot(cls_ids, num_classes, dtype=jnp.float32)
    gt = jnp.concatenate([mask, gt_boxes, gt_deltas, gt_cls], axis=-1)   # (B, A, 12)

    weights = dict(class_loss_weight=1.0, positive_score_loss_weight=3.75,
                   negative_score_loss_weight=100.0, bbox_loss_weight=6.0)

    # anchor_tile=128 so the A=256 test exercises the multi-tile
    # accumulate/finalize path (nk = 2).
    loss, loss_stat = squeezedet_loss(pred, gt, anchors,
                                      num_classes=num_classes,
                                      input_size=input_size,
                                      anchor_tile=128, **weights)
    jax.block_until_ready(loss)

    ref = reference_loss(pred, gt, anchors, num_classes=num_classes, num_anchors=A,
                         input_size=input_size,
                         w_cls=weights['class_loss_weight'],
                         w_pos=weights['positive_score_loss_weight'],
                         w_neg=weights['negative_score_loss_weight'],
                         w_bbox=weights['bbox_loss_weight'])
    for got, want in zip((loss, loss_stat['class_loss'],
                          loss_stat['score_loss'], loss_stat['bbox_loss']), ref):
        np.testing.assert_allclose(np.asarray(got), np.asarray(want), rtol=1e-5, atol=1e-5)

    print("KERNEL_OK")
</pallas_src>

<mosaic_0001>
module attributes {stable_mosaic.version = 11 : i64} {
  func.func @_loss_kernel(%arg0: i32, %arg1: i32, %arg2: memref<1x8x128xf32, #tpu.memory_space<vmem>>, %arg3: memref<1x12x128xf32, #tpu.memory_space<vmem>>, %arg4: memref<4x128xf32, #tpu.memory_space<vmem>>, %arg5: memref<1x1x4xf32, #tpu.memory_space<vmem>>, %arg6: memref<1x128xf32, #tpu.memory_space<vmem>>, %arg7: memref<1x128xf32, #tpu.memory_space<vmem>>, %arg8: memref<1x128xf32, #tpu.memory_space<vmem>>, %arg9: memref<1x128xf32, #tpu.memory_space<vmem>>, %arg10: memref<1x128xf32, #tpu.memory_space<vmem>>) attributes {dimension_semantics = [#tpu.dimension_semantics<parallel>, #tpu.dimension_semantics<arbitrary>], iteration_bounds = array<i64: 2, 2>, scalar_prefetch = 0 : i64, scratch_operands = 5 : i64, tpu.core_type = #tpu.core_type<tc>, window_params = [{transform_indices = @transform_0, window_bounds = array<i64: 1, 8, 128>}, {transform_indices = @transform_1, window_bounds = array<i64: 1, 12, 128>}, {transform_indices = @transform_2, window_bounds = array<i64: 4, 128>}, {transform_indices = @transform_3, window_bounds = array<i64: 1, 1, 4>}]} {
    %c0_i32 = arith.constant 0 : i32
    %0 = arith.cmpi eq, %arg1, %c0_i32 : i32
    %1 = arith.extui %0 : i1 to i32
    %c0_i32_0 = arith.constant 0 : i32
    %2 = arith.cmpi ne, %1, %c0_i32_0 : i32
    scf.if %2 {
      %cst_50 = arith.constant 0.000000e+00 : f32
      %136 = vector.broadcast %cst_50 : f32 to vector<1x128xf32>
      %c0_51 = arith.constant 0 : index
      %c0_52 = arith.constant 0 : index
      %137 = vector.load %arg6[%c0_51, %c0_52] : memref<1x128xf32, #tpu.memory_space<vmem>>, vector<1x128xf32>
      tpu.vector_store %arg6[%c0_51, %c0_52], %136 {strides = array<i32>} : memref<1x128xf32, #tpu.memory_space<vmem>>, vector<1x128xf32>,
      %cst_53 = arith.constant 0.000000e+00 : f32
      %138 = vector.broadcast %cst_53 : f32 to vector<1x128xf32>
      %c0_54 = arith.constant 0 : index
      %c0_55 = arith.constant 0 : index
      %139 = vector.load %arg7[%c0_54, %c0_55] : memref<1x128xf32, #tpu.memory_space<vmem>>, vector<1x128xf32>
      tpu.vector_store %arg7[%c0_54, %c0_55], %138 {strides = array<i32>} : memref<1x128xf32, #tpu.memory_space<vmem>>, vector<1x128xf32>,
      %cst_56 = arith.constant 0.000000e+00 : f32
      %140 = vector.broadcast %cst_56 : f32 to vector<1x128xf32>
      %c0_57 = arith.constant 0 : index
      %c0_58 = arith.constant 0 : index
      %141 = vector.load %arg8[%c0_57, %c0_58] : memref<1x128xf32, #tpu.memory_space<vmem>>, vector<1x128xf32>
      tpu.vector_store %arg8[%c0_57, %c0_58], %140 {strides = array<i32>} : memref<1x128xf32, #tpu.memory_space<vmem>>, vector<1x128xf32>,
      %cst_59 = arith.constant 0.000000e+00 : f32
      %142 = vector.broadcast %cst_59 : f32 to vector<1x128xf32>
      %c0_60 = arith.constant 0 : index
      %c0_61 = arith.constant 0 : index
      %143 = vector.load %arg9[%c0_60, %c0_61] : memref<1x128xf32, #tpu.memory_space<vmem>>, vector<1x128xf32>
      tpu.vector_store %arg9[%c0_60, %c0_61], %142 {strides = array<i32>} : memref<1x128xf32, #tpu.memory_space<vmem>>, vector<1x128xf32>,
      %cst_62 = arith.constant 0.000000e+00 : f32
      %144 = vector.broadcast %cst_62 : f32 to vector<1x128xf32>
      %c0_63 = arith.constant 0 : index
      %c0_64 = arith.constant 0 : index
      %145 = vector.load %arg10[%c0_63, %c0_64] : memref<1x128xf32, #tpu.memory_space<vmem>>, vector<1x128xf32>
      tpu.vector_store %arg10[%c0_63, %c0_64], %144 {strides = array<i32>} : memref<1x128xf32, #tpu.memory_space<vmem>>, vector<1x128xf32>,
    } else {
    }
    %c0 = arith.constant 0 : index
    %c0_1 = arith.constant 0 : index
    %c0_2 = arith.constant 0 : index
    %3 = vector.load %arg2[%c0, %c0_1, %c0_2] : memref<1x8x128xf32, #tpu.memory_space<vmem>>, vector<1x8x128xf32>
    %4 = vector.shape_cast %3 : vector<1x8x128xf32> to vector<8x128xf32>
    %c0_3 = arith.constant 0 : index
    %c0_4 = arith.constant 0 : index
    %c0_5 = arith.constant 0 : index
    %5 = vector.load %arg3[%c0_3, %c0_4, %c0_5] : memref<1x12x128xf32, #tpu.memory_space<vmem>>, vector<1x12x128xf32>
    %6 = vector.shape_cast %5 : vector<1x12x128xf32> to vector<12x128xf32>
    %c0_6 = arith.constant 0 : index
    %c0_7 = arith.constant 0 : index
    %7 = vector.load %arg4[%c0_6, %c0_7] : memref<4x128xf32, #tpu.memory_space<vmem>>, vector<4x128xf32>
    %8 = vector.extract_strided_slice %6 {offsets = [0, 0], sizes = [1, 128], strides = [1, 1]} : vector<12x128xf32> to vector<1x128xf32>
    %9 = vector.extract_strided_slice %6 {offsets = [1, 0], sizes = [1, 128], strides = [1, 1]} : vector<12x128xf32> to vector<1x128xf32>
    %10 = vector.extract_strided_slice %6 {offsets = [2, 0], sizes = [1, 128], strides = [1, 1]} : vector<12x128xf32> to vector<1x128xf32>
    %11 = vector.extract_strided_slice %6 {offsets = [3, 0], sizes = [1, 128], strides = [1, 1]} : vector<12x128xf32> to vector<1x128xf32>
    %12 = vector.extract_strided_slice %6 {offsets = [4, 0], sizes = [1, 128], strides = [1, 1]} : vector<12x128xf32> to vector<1x128xf32>
    %13 = vector.extract_strided_slice %6 {offsets = [5, 0], sizes = [4, 128], strides = [1, 1]} : vector<12x128xf32> to vector<4x128xf32>
    %14 = vector.extract_strided_slice %6 {offsets = [9, 0], sizes = [3, 128], strides = [1, 1]} : vector<12x128xf32> to vector<3x128xf32>
    %15 = vector.extract_strided_slice %4 {offsets = [0, 0], sizes = [3, 128], strides = [1, 1]} : vector<8x128xf32> to vector<3x128xf32>
    %16 = vector.extract_strided_slice %4 {offsets = [3, 0], sizes = [1, 128], strides = [1, 1]} : vector<8x128xf32> to vector<1x128xf32>
    %17 = vector.extract_strided_slice %4 {offsets = [4, 0], sizes = [4, 128], strides = [1, 1]} : vector<8x128xf32> to vector<4x128xf32>
    %cst = arith.constant dense<0xFF800000> : vector<128xf32>
    %18 = vector.multi_reduction <maximumf>, %15, %cst [0] : vector<3x128xf32> to vector<128xf32>
    %19 = vector.shape_cast %18 : vector<128xf32> to vector<1x128xf32>
    %20 = vector.broadcast %19 : vector<1x128xf32> to vector<3x128xf32>
    %21 = arith.subf %15, %20 : vector<3x128xf32>
    %22 = math.exp %21 : vector<3x128xf32>
    %cst_8 = arith.constant dense<0.000000e+00> : vector<128xf32>
    %23 = vector.multi_reduction <add>, %22, %cst_8 [0] : vector<3x128xf32> to vector<128xf32>
    %24 = vector.shape_cast %23 : vector<128xf32> to vector<1x128xf32>
    %25 = math.log %24 : vector<1x128xf32>
    %cst_9 = arith.constant dense<0.000000e+00> : vector<128xf32>
    %26 = vector.multi_reduction <add>, %14, %cst_9 [0] : vector<3x128xf32> to vector<128xf32>
    %27 = vector.shape_cast %26 : vector<128xf32> to vector<1x128xf32>
    %28 = arith.mulf %14, %21 : vector<3x128xf32>
    %cst_10 = arith.constant dense<0.000000e+00> : vector<128xf32>
    %29 = vector.multi_reduction <add>, %28, %cst_10 [0] : vector<3x128xf32> to vector<128xf32>
    %30 = vector.shape_cast %29 : vector<128xf32> to vector<1x128xf32>
    %31 = arith.mulf %27, %25 : vector<1x128xf32>
    %32 = arith.subf %31, %30 : vector<1x128xf32>
    %33 = arith.mulf %8, %32 : vector<1x128xf32>
    %34 = arith.negf %16 : vector<1x128xf32>
    %35 = math.exp %34 : vector<1x128xf32>
    %cst_11 = arith.constant 1.000000e+00 : f32
    %36 = vector.broadcast %cst_11 : f32 to vector<1x128xf32>
    %37 = arith.addf %36, %35 : vector<1x128xf32>
    %38 = arith.divf %36, %37 : vector<1x128xf32>
    %39 = vector.extract_strided_slice %7 {offsets = [0, 0], sizes = [1, 128], strides = [1, 1]} : vector<4x128xf32> to vector<1x128xf32>
    %40 = vector.extract_strided_slice %7 {offsets = [1, 0], sizes = [1, 128], strides = [1, 1]} : vector<4x128xf32> to vector<1x128xf32>
    %41 = vector.extract_strided_slice %7 {offsets = [2, 0], sizes = [1, 128], strides = [1, 1]} : vector<4x128xf32> to vector<1x128xf32>
    %42 = vector.extract_strided_slice %7 {offsets = [3, 0], sizes = [1, 128], strides = [1, 1]} : vector<4x128xf32> to vector<1x128xf32>
    %43 = vector.extract_strided_slice %17 {offsets = [0, 0], sizes = [1, 128], strides = [1, 1]} : vector<4x128xf32> to vector<1x128xf32>
    %44 = arith.mulf %43, %41 : vector<1x128xf32>
    %45 = arith.addf %39, %44 : vector<1x128xf32>
    %46 = vector.extract_strided_slice %17 {offsets = [1, 0], sizes = [1, 128], strides = [1, 1]} : vector<4x128xf32> to vector<1x128xf32>
    %47 = arith.mulf %46, %42 : vector<1x128xf32>
    %48 = arith.addf %40, %47 : vector<1x128xf32>
    %49 = vector.extract_strided_slice %17 {offsets = [2, 0], sizes = [1, 128], strides = [1, 1]} : vector<4x128xf32> to vector<1x128xf32>
    %50 = math.exp %49 : vector<1x128xf32>
    %51 = arith.mulf %41, %50 : vector<1x128xf32>
    %52 = vector.extract_strided_slice %17 {offsets = [3, 0], sizes = [1, 128], strides = [1, 1]} : vector<4x128xf32> to vector<1x128xf32>
    %53 = math.exp %52 : vector<1x128xf32>
    %54 = arith.mulf %42, %53 : vector<1x128xf32>
    %cst_12 = arith.constant 5.000000e-01 : f32
    %55 = vector.broadcast %cst_12 : f32 to vector<1x128xf32>
    %56 = arith.mulf %55, %51 : vector<1x128xf32>
    %57 = arith.subf %45, %56 : vector<1x128xf32>
    %cst_13 = arith.constant 0.000000e+00 : f32
    %cst_14 = arith.constant 6.300000e+01 : f32
    %58 = vector.broadcast %cst_13 : f32 to vector<1x128xf32>
    %59 = arith.maximumf %58, %57 : vector<1x128xf32>
    %60 = vector.broadcast %cst_14 : f32 to vector<1x128xf32>
    %61 = arith.minimumf %60, %59 : vector<1x128xf32>
    %cst_15 = arith.constant 5.000000e-01 : f32
    %62 = vector.broadcast %cst_15 : f32 to vector<1x128xf32>
    %63 = arith.mulf %62, %54 : vector<1x128xf32>
    %64 = arith.subf %48, %63 : vector<1x128xf32>
    %cst_16 = arith.constant 0.000000e+00 : f32
    %cst_17 = arith.constant 6.300000e+01 : f32
    %65 = vector.broadcast %cst_16 : f32 to vector<1x128xf32>
    %66 = arith.maximumf %65, %64 : vector<1x128xf32>
    %67 = vector.broadcast %cst_17 : f32 to vector<1x128xf32>
    %68 = arith.minimumf %67, %66 : vector<1x128xf32>
    %cst_18 = arith.constant 5.000000e-01 : f32
    %69 = vector.broadcast %cst_18 : f32 to vector<1x128xf32>
    %70 = arith.mulf %69, %51 : vector<1x128xf32>
    %71 = arith.addf %45, %70 : vector<1x128xf32>
    %cst_19 = arith.constant 0.000000e+00 : f32
    %cst_20 = arith.constant 6.300000e+01 : f32
    %72 = vector.broadcast %cst_19 : f32 to vector<1x128xf32>
    %73 = arith.maximumf %72, %71 : vector<1x128xf32>
    %74 = vector.broadcast %cst_20 : f32 to vector<1x128xf32>
    %75 = arith.minimumf %74, %73 : vector<1x128xf32>
    %cst_21 = arith.constant 5.000000e-01 : f32
    %76 = vector.broadcast %cst_21 : f32 to vector<1x128xf32>
    %77 = arith.mulf %76, %54 : vector<1x128xf32>
    %78 = arith.addf %48, %77 : vector<1x128xf32>
    %cst_22 = arith.constant 0.000000e+00 : f32
    %cst_23 = arith.constant 6.300000e+01 : f32
    %79 = vector.broadcast %cst_22 : f32 to vector<1x128xf32>
    %80 = arith.maximumf %79, %78 : vector<1x128xf32>
    %81 = vector.broadcast %cst_23 : f32 to vector<1x128xf32>
    %82 = arith.minimumf %81, %80 : vector<1x128xf32>
    %83 = arith.minimumf %11, %75 : vector<1x128xf32>
    %84 = arith.maximumf %9, %61 : vector<1x128xf32>
    %85 = arith.subf %83, %84 : vector<1x128xf32>
    %cst_24 = arith.constant 0.000000e+00 : f32
    %86 = vector.broadcast %cst_24 : f32 to vector<1x128xf32>
    %87 = arith.maximumf %85, %86 : vector<1x128xf32>
    %88 = arith.minimumf %12, %82 : vector<1x128xf32>
    %89 = arith.maximumf %10, %68 : vector<1x128xf32>
    %90 = arith.subf %88, %89 : vector<1x128xf32>
    %cst_25 = arith.constant 0.000000e+00 : f32
    %91 = vector.broadcast %cst_25 : f32 to vector<1x128xf32>
    %92 = arith.maximumf %90, %91 : vector<1x128xf32>
    %93 = arith.mulf %87, %92 : vector<1x128xf32>
    %94 = arith.subf %11, %9 : vector<1x128xf32>
    %95 = arith.subf %12, %10 : vector<1x128xf32>
    %96 = arith.mulf %94, %95 : vector<1x128xf32>
    %97 = arith.subf %75, %61 : vector<1x128xf32>
    %98 = arith.subf %82, %68 : vector<1x128xf32>
    %99 = arith.mulf %97, %98 : vector<1x128xf32>
    %100 = arith.addf %96, %99 : vector<1x128xf32>
    %101 = arith.subf %100, %93 : vector<1x128xf32>
    %cst_26 = arith.constant 1.000000e-10 : f32
    %102 = vector.broadcast %cst_26 : f32 to vector<1x128xf32>
    %103 = arith.addf %101, %102 : vector<1x128xf32>
    %104 = arith.divf %93, %103 : vector<1x128xf32>
    %105 = arith.mulf %104, %8 : vector<1x128xf32>
    %106 = arith.subf %105, %38 : vector<1x128xf32>
    %107 = arith.mulf %106, %106 : vector<1x128xf32>
    %108 = arith.subf %17, %13 : vector<4x128xf32>
    %109 = arith.mulf %108, %108 : vector<4x128xf32>
    %110 = vector.broadcast %8 : vector<1x128xf32> to vector<4x128xf32>
    %111 = arith.mulf %110, %109 : vector<4x128xf32>
    %cst_27 = arith.constant dense<0.000000e+00> : vector<128xf32>
    %112 = vector.multi_reduction <add>, %111, %cst_27 [0] : vector<4x128xf32> to vector<128xf32>
    %113 = vector.shape_cast %112 : vector<128xf32> to vector<1x128xf32>
    %c0_28 = arith.constant 0 : index
    %c0_29 = arith.constant 0 : index
    %114 = vector.load %arg6[%c0_28, %c0_29] : memref<1x128xf32, #tpu.memory_space<vmem>>, vector<1x128xf32>
    %115 = arith.addf %114, %8 : vector<1x128xf32>
    %c0_30 = arith.constant 0 : index
    %c0_31 = arith.constant 0 : index
    %116 = vector.load %arg6[%c0_30, %c0_31] : memref<1x128xf32, #tpu.memory_space<vmem>>, vector<1x128xf32>
    tpu.vector_store %arg6[%c0_30, %c0_31], %115 {strides = array<i32>} : memref<1x128xf32, #tpu.memory_space<vmem>>, vector<1x128xf32>,
    %c0_32 = arith.constant 0 : index
    %c0_33 = arith.constant 0 : index
    %117 = vector.load %arg7[%c0_32, %c0_33] : memref<1x128xf32, #tpu.memory_space<vmem>>, vector<1x128xf32>
    %118 = arith.addf %117, %33 : vector<1x128xf32>
    %c0_34 = arith.constant 0 : index
    %c0_35 = arith.constant 0 : index
    %119 = vector.load %arg7[%c0_34, %c0_35] : memref<1x128xf32, #tpu.memory_space<vmem>>, vector<1x128xf32>
    tpu.vector_store %arg7[%c0_34, %c0_35], %118 {strides = array<i32>} : memref<1x128xf32, #tpu.memory_space<vmem>>, vector<1x128xf32>,
    %c0_36 = arith.constant 0 : index
    %c0_37 = arith.constant 0 : index
    %120 = vector.load %arg8[%c0_36, %c0_37] : memref<1x128xf32, #tpu.memory_space<vmem>>, vector<1x128xf32>
    %121 = arith.mulf %8, %107 : vector<1x128xf32>
    %122 = arith.addf %120, %121 : vector<1x128xf32>
    %c0_38 = arith.constant 0 : index
    %c0_39 = arith.constant 0 : index
    %123 = vector.load %arg8[%c0_38, %c0_39] : memref<1x128xf32, #tpu.memory_space<vmem>>, vector<1x128xf32>
    tpu.vector_store %arg8[%c0_38, %c0_39], %122 {strides = array<i32>} : memref<1x128xf32, #tpu.memory_space<vmem>>, vector<1x128xf32>,
    %c0_40 = arith.constant 0 : index
    %c0_41 = arith.constant 0 : index
    %124 = vector.load %arg9[%c0_40, %c0_41] : memref<1x128xf32, #tpu.memory_space<vmem>>, vector<1x128xf32>
    %cst_42 = arith.constant 1.000000e+00 : f32
    %125 = vector.broadcast %cst_42 : f32 to vector<1x128xf32>
    %126 = arith.subf %125, %8 : vector<1x128xf32>
    %127 = arith.mulf %126, %107 : vector<1x128xf32>
    %128 = arith.addf %124, %127 : vector<1x128xf32>
    %c0_43 = arith.constant 0 : index
    %c0_44 = arith.constant 0 : index
    %129 = vector.load %arg9[%c0_43, %c0_44] : memref<1x128xf32, #tpu.memory_space<vmem>>, vector<1x128xf32>
    tpu.vector_store %arg9[%c0_43, %c0_44], %128 {strides = array<i32>} : memref<1x128xf32, #tpu.memory_space<vmem>>, vector<1x128xf32>,
    %c0_45 = arith.constant 0 : index
    %c0_46 = arith.constant 0 : index
    %130 = vector.load %arg10[%c0_45, %c0_46] : memref<1x128xf32, #tpu.memory_space<vmem>>, vector<1x128xf32>
    %131 = arith.addf %130, %113 : vector<1x128xf32>
    %c0_47 = arith.constant 0 : index
    %c0_48 = arith.constant 0 : index
    %132 = vector.load %arg10[%c0_47, %c0_48] : memref<1x128xf32, #tpu.memory_space<vmem>>, vector<1x128xf32>
    tpu.vector_store %arg10[%c0_47, %c0_48], %131 {strides = array<i32>} : memref<1x128xf32, #tpu.memory_space<vmem>>, vector<1x128xf32>,
    %c1_i32 = arith.constant 1 : i32
    %133 = arith.cmpi eq, %arg1, %c1_i32 : i32
    %134 = arith.extui %133 : i1 to i32
    %c0_i32_49 = arith.constant 0 : i32
    %135 = arith.cmpi ne, %134, %c0_i32_49 : i32
    scf.if %135 {
      %c0_50 = arith.constant 0 : index
      %c0_51 = arith.constant 0 : index
      %136 = vector.load %arg6[%c0_50, %c0_51] : memref<1x128xf32, #tpu.memory_space<vmem>>, vector<1x128xf32>
      %cst_52 = arith.constant dense<0.000000e+00> : vector<1xf32>
      %137 = vector.multi_reduction <add>, %136, %cst_52 [1] : vector<1x128xf32> to vector<1xf32>
      %138 = vector.shape_cast %137 : vector<1xf32> to vector<1x1xf32>
      %c0_53 = arith.constant 0 : index
      %c0_54 = arith.constant 0 : index
      %139 = vector.load %arg7[%c0_53, %c0_54] : memref<1x128xf32, #tpu.memory_space<vmem>>, vector<1x128xf32>
      %cst_55 = arith.constant dense<0.000000e+00> : vector<1xf32>
      %140 = vector.multi_reduction <add>, %139, %cst_55 [1] : vector<1x128xf32> to vector<1xf32>
      %141 = vector.shape_cast %140 : vector<1xf32> to vector<1x1xf32>
      %cst_56 = arith.constant 1.000000e+00 : f32
      %142 = vector.broadcast %cst_56 : f32 to vector<1x1xf32>
      %143 = arith.mulf %142, %141 : vector<1x1xf32>
      %144 = arith.divf %143, %138 : vector<1x1xf32>
      %c0_57 = arith.constant 0 : index
      %c0_58 = arith.constant 0 : index
      %145 = vector.load %arg8[%c0_57, %c0_58] : memref<1x128xf32, #tpu.memory_space<vmem>>, vector<1x128xf32>
      %cst_59 = arith.constant dense<0.000000e+00> : vector<1xf32>
      %146 = vector.multi_reduction <add>, %145, %cst_59 [1] : vector<1x128xf32> to vector<1xf32>
      %147 = vector.shape_cast %146 : vector<1xf32> to vector<1x1xf32>
      %cst_60 = arith.constant 3.750000e+00 : f32
      %148 = vector.broadcast %cst_60 : f32 to vector<1x1xf32>
      %149 = arith.mulf %148, %147 : vector<1x1xf32>
      %150 = arith.divf %149, %138 : vector<1x1xf32>
      %c0_61 = arith.constant 0 : index
      %c0_62 = arith.constant 0 : index
      %151 = vector.load %arg9[%c0_61, %c0_62] : memref<1x128xf32, #tpu.memory_space<vmem>>, vector<1x128xf32>
      %cst_63 = arith.constant dense<0.000000e+00> : vector<1xf32>
      %152 = vector.multi_reduction <add>, %151, %cst_63 [1] : vector<1x128xf32> to vector<1xf32>
      %153 = vector.shape_cast %152 : vector<1xf32> to vector<1x1xf32>
      %cst_64 = arith.constant 1.000000e+02 : f32
      %154 = vector.broadcast %cst_64 : f32 to vector<1x1xf32>
      %155 = arith.mulf %154, %153 : vector<1x1xf32>
      %cst_65 = arith.constant 2.560000e+02 : f32
      %156 = vector.broadcast %cst_65 : f32 to vector<1x1xf32>
      %157 = arith.subf %156, %138 : vector<1x1xf32>
      %158 = arith.divf %155, %157 : vector<1x1xf32>
      %c0_66 = arith.constant 0 : index
      %c0_67 = arith.constant 0 : index
      %159 = vector.load %arg10[%c0_66, %c0_67] : memref<1x128xf32, #tpu.memory_space<vmem>>, vector<1x128xf32>
      %cst_68 = arith.constant dense<0.000000e+00> : vector<1xf32>
      %160 = vector.multi_reduction <add>, %159, %cst_68 [1] : vector<1x128xf32> to vector<1xf32>
      %161 = vector.shape_cast %160 : vector<1xf32> to vector<1x1xf32>
      %cst_69 = arith.constant 6.000000e+00 : f32
      %162 = vector.broadcast %cst_69 : f32 to vector<1x1xf32>
      %163 = arith.mulf %162, %161 : vector<1x1xf32>
      %164 = arith.divf %163, %138 : vector<1x1xf32>
      %165 = arith.addf %150, %158 : vector<1x1xf32>
      %166 = arith.addf %144, %165 : vector<1x1xf32>
      %167 = arith.addf %166, %164 : vector<1x1xf32>
      %168 = tpu.iota {dimensions = array<i32: 1>} : vector<1x4xi32>
      %c0_i32_70 = arith.constant 0 : i32
      %169 = vector.broadcast %c0_i32_70 : i32 to vector<1x4xi32>
      %170 = arith.cmpi eq, %168, %169 : vector<1x4xi32>
      %c1_i32_71 = arith.constant 1 : i32
      %171 = vector.broadcast %c1_i32_71 : i32 to vector<1x4xi32>
      %172 = arith.cmpi eq, %168, %171 : vector<1x4xi32>
      %c2_i32 = arith.constant 2 : i32
      %173 = vector.broadcast %c2_i32 : i32 to vector<1x4xi32>
      %174 = arith.cmpi eq, %168, %173 : vector<1x4xi32>
      %175 = vector.shape_cast %165 : vector<1x1xf32> to vector<1x1xf32>
      %176 = vector.broadcast %175 : vector<1x1xf32> to vector<1x4xf32>
      %177 = vector.shape_cast %164 : vector<1x1xf32> to vector<1x1xf32>
      %178 = vector.broadcast %177 : vector<1x1xf32> to vector<1x4xf32>
      %179 = arith.select %174, %176, %178 : vector<1x4xi1>, vector<1x4xf32>
      %180 = vector.shape_cast %144 : vector<1x1xf32> to vector<1x1xf32>
      %181 = vector.broadcast %180 : vector<1x1xf32> to vector<1x4xf32>
      %182 = arith.select %172, %181, %179 : vector<1x4xi1>, vector<1x4xf32>
      %183 = vector.shape_cast %167 : vector<1x1xf32> to vector<1x1xf32>
      %184 = vector.broadcast %183 : vector<1x1xf32> to vector<1x4xf32>
      %185 = arith.select %170, %184, %182 : vector<1x4xi1>, vector<1x4xf32>
      %c0_72 = arith.constant 0 : index
      %c0_73 = arith.constant 0 : index
      %c0_74 = arith.constant 0 : index
      %186 = vector.load %arg5[%c0_72, %c0_73, %c0_74] : memref<1x1x4xf32, #tpu.memory_space<vmem>>, vector<1x1x4xf32>
      %187 = vector.shape_cast %186 : vector<1x1x4xf32> to vector<1x4xf32>
      %188 = vector.shape_cast %185 : vector<1x4xf32> to vector<1x1x4xf32>
      tpu.vector_store %arg5[%c0_72, %c0_73, %c0_74], %188 {strides = array<i32>} : memref<1x1x4xf32, #tpu.memory_space<vmem>>, vector<1x1x4xf32>,
    } else {
    }
    return
  }
  func.func @transform_0(%arg0: i32, %arg1: i32) -> (i32, i32, i32) {
    %c0_i32 = arith.constant 0 : i32
    %c0_i32_0 = arith.constant 0 : i32
    return %arg0, %c0_i32, %arg1 : i32, i32, i32
  }
  func.func @transform_1(%arg0: i32, %arg1: i32) -> (i32, i32, i32) {
    %c0_i32 = arith.constant 0 : i32
    %c0_i32_0 = arith.constant 0 : i32
    return %arg0, %c0_i32, %arg1 : i32, i32, i32
  }
  func.func @transform_2(%arg0: i32, %arg1: i32) -> (i32, i32) {
    %c0_i32 = arith.constant 0 : i32
    %c0_i32_0 = arith.constant 0 : i32
    return %c0_i32, %arg1 : i32, i32
  }
  func.func @transform_3(%arg0: i32, %arg1: i32) -> (i32, i32, i32) {
    %c0_i32 = arith.constant 0 : i32
    %c0_i32_0 = arith.constant 0 : i32
    %c0_i32_1 = arith.constant 0 : i32
    return %arg0, %c0_i32, %c0_i32_0 : i32, i32, i32
  }
}

</mosaic_0001>

<bundles_post_ra>
// kernel: tpu_custom_call.1
= control target key start
LH: loop header
LB: loop body
LE: loop exit
PB: predicated region body
PF: predicated region fallthrough
CT: control target
= control target key end

     0   :  { %s1074_s0 = inlined_call_operand.vmem [shape: f32[2,8,256], index: 0, kind: input, shape index: {}]   ;;  %s1075_s1 = inlined_call_operand.vmem [shape: f32[2,12,256], index: 1, kind: input, shape index: {}]   ;;  %s1076_s2 = inlined_call_operand.vmem [shape: f32[4,256], index: 2, kind: input, shape index: {}]   ;;  %s1077_s3 = inlined_call_operand.hbm [shape: f32[2,1,4], index: 3, kind: output, shape index: {}]  }
   0x1   :  { %1082 = sst [smem:[#allocation15_spill]] %s1075_s1 }
   0x2   :  { %8 = vsyncpa [#allocation9], 0 }
   0x3   :  { %10 = vsyncpa [#allocation9 + $0x1], 0  ;;  %s867_s12 = smov 0   ;;  %s869_s13 = smov 0  }
   0x4   :  { %s871_s14 = smov 0   ;;  %s873_s15 = smov 0  }
   0x5   :  { %s875_s16 = smov 0   ;;  %s877_s17 = smov 0  }
   0x6   :  { %s879_s18 = smov 0   ;;  %s881_s19 = smov 0  }
   0x7   :  { %s883_s20 = smov 0   ;;  %s885_s21 = smov 0  }
   0x8 LB: > { %1083 = sst [smem:[#allocation11_spill]] %s835_s19  ;;  %s611_s22 = sadd.s32 4294967295, %s843_s21   ;;  %s843_s21 = sphi %s885_s21, %s16_s21   ;;  %s839_s20 = sphi %s883_s20, %s1094_s20   ;;  %s835_s19 = sphi %s881_s19, %s1093_s19   ;;  %s831_s18 = sphi %s879_s18, %s1092_s18   ;;  %s827_s17 = sphi %s877_s17, %s1091_s17   ;;  %s823_s16 = sphi %s875_s16, %s1099_s16   ;;  %s819_s15 = sphi %s873_s15, %s1098_s15   ;;  %s815_s14 = sphi %s871_s14, %s1097_s14   ;;  %s811_s13 = sphi %s869_s13, %s1096_s13   ;;  %s807_s12 = sphi %s867_s12, %s1095_s12  }
   0x9   : > { %1084 = sst [smem:[#allocation12_spill]] %s839_s20  ;;  %s612_s23 = sadd.s32 4294967294, %s843_s21  }
   0xa   : > { %s25_s24 = sadd.s32 1, %s835_s19  ;;  %s28_s25 = sadd.s32 1, %s839_s20 }
   0xb   : > { %p26_p0 = scmp.ge.s32.totalorder %s25_s24, 2  ;;  %s65_s26 = sadd.s32 1, %s823_s16 }
   0xc   : > { %p72_p1 = scmp.ne.s32.totalorder %s823_s16, %s819_s15  ;;  %p73_p2 = scmp.eq.s32.totalorder %s843_s21, 0 }
   0xd   : > { %s1101_s24 = smov (%p26_p0, %s25_s24), 0  ;;  %s1103_s25 = smov (!%p26_p0, %s28_s25), %s839_s20 }
   0xe   : > { %1085 = sst [smem:[#allocation13_spill]] %s1101_s24  ;;  %s61_s27 = ssub.s32 %s835_s19, %s1101_s24 }
   0xf   : > { %p930_p3 = por %p73_p2, %p72_p1  ;;  %p30_p4 = scmp.ge.s32.totalorder %s1103_s25, 2 }
  0x10   : > { %s117_s29 = sadd.s32 1, %s815_s14  ;;  %p127_p5 = scmp.ne.s32.totalorder %s815_s14, %s811_s13 }
  0x11   : > { %p128_p6 = scmp.eq.s32.totalorder %s611_s22, 3  ;;  %s1105_s25 = smov (%p30_p4, %s1103_s25), 0 }
  0x12   : > { %1087 = sst [smem:[#allocation14_spill]] %s1105_s25  ;;  %p133_p8 = scmp.ne.s32.totalorder %s811_s13, %s807_s12 }
  0x13   : > { %p939_p7 = por %p128_p6, %p127_p5  ;;  %s60_s4 = ssub.s32 %s839_s20, %s1105_s25 }
  0x14   : > { %p134_p9 = scmp.eq.s32.totalorder %s612_s23, 3  ;;  %s62_s5 = sor.u32 %s61_s27, %s60_s4 }
  0x15   : > { %p115_p10 = scmp.eq.s32.totalorder %s60_s4, 0  ;;  %p63_p11 = scmp.eq.s32.totalorder %s62_s5, 0 }
  0x16   : > { %p947_p12 = por %p134_p9, %p133_p8  ;;  %p614_p13 = scmp.ge.s32.totalorder %s843_s21, 4 }
  0x17   : > { %s952_s7 = scalar_select %p115_p10, %s815_s14, %s117_s29  }
  0x18   : > { %s955_s8 = scalar_select %p63_p11, %s823_s16, %s65_s26  }
  0x19   : > { %150 = sbr.rel (%p614_p13) target bundleno = 43 (0x2b), region = 16 }
  0x20   : > { %164 = sbr.rel (!%p930_p3) target bundleno = 43 (0x2b), region = 24  ;;  %s166_s9 = sand.u32 (%p930_p3), 1, %s823_s16  }
  0x21   : > { %s616_s10 = sshll.u32 (%p930_p3), %s839_s20, 2  ;;  %s615_s11 = sshll.u32 (%p930_p3), %s166_s9, 4 }
  0x22   : > { %s170_s22 = sadd.s32 (%p930_p3), %s835_s19, %s616_s10  ;;  %s1090_s1 = sld [smem:[#allocation15_spill]] (%p930_p3) }
  0x23   : > { %s617_s23 = sshll.u32 (%p930_p3), %s170_s22, 3  ;;  %s168_s26 = scalar_lea.vmem (%p930_p3), [#allocation7], %s615_s11 }
  0x28   : > { %s172_s29 = scalar_lea.vmem %s1090_s1, %s617_s23 }
  0x29   : > { %v202_v0 = vld [vmem:[%s172_s29] sm:$0xff]  ;;  %v204_v1 = vld [vmem:[%s172_s29 + $0x10] sm:$0xff] }
  0x2a   : > { %203 = vst [vmem:[%s168_s26] sm:$0xff] %v202_v0  ;;  %205 = vst [vmem:[%s168_s26 + $0x8] sm:$0xff] %v204_v1 }
  0x2b PF: > { %p618_p0 = scmp.ge.s32.totalorder %s843_s21, 1  ;;  %p217_p1 = scmp.lt.s32.totalorder %s843_s21, 5 }
  0x2d   : > { %p218_p2 = pnand %p618_p0, %p217_p1 }
  0x2e   : > { %s224_s28 = sand.u32 (!%p218_p2), 1, %s819_s15   ;;  %s256_s5 = sand.u32 (!%p218_p2), 1, %s811_s13  }
  0x2f   : > { %221 = sbr.rel (%p218_p2) target bundleno = 323 (0x143), region = 66  ;;  %s619_s9 = sshll.u32 (!%p218_p2), %s224_s28, 4 }
  0x30   : > { %p258_p3 = scmp.lt.s32.totalorder (!%p218_p2), %s831_s18, 1  ;;  %p260_p4 = scmp.lt.s32.totalorder (!%p218_p2), %s827_s17, 1 }
  0x31   : > { %s226_s19 = scalar_lea.vmem (!%p218_p2), [#allocation7], %s619_s9  ;;  %s982_s15 = scalar_lea.vmem (!%p218_p2), [#allocation8], %s256_s5 }
  0x32   : > { %p623_p5 = scmp.ne.s32.totalorder (!%p218_p2), %s827_s17, 0 }
  0x36   : > { %s259_s10 = scalar_select %p258_p3, %s831_s18, 1 }
  0x37   : > { %s261_s11 = scalar_select %p260_p4, %s827_s17, 1 }
  0x38   : > { %s620_s22 = sshll.u32 %s259_s10, 1  ;;  %273 = sbr.rel (%p623_p5) target bundleno = 63 (0x3f), region = 74  ;;  %v845_v2 = vmov (!%p623_p5), 0.0  }
  0x39   : > { %s263_s23 = sadd.s32 %s620_s22, %s261_s11  ;;  %s622_s27 = sshll.u32 %s261_s11, 2  ;;  %274 = vst [vmem:[#allocation2] sm:$0x1] (!%p623_p5), %v845_v2  ;;  %275 = vst [vmem:[#allocation3] sm:$0x1] (!%p623_p5), %v845_v2 }
  0x3a   : > { %s621_s4 = sshll.u32 %s263_s23, 3  ;;  %s269_s1 = scalar_lea.vmem %s1076_s2, %s622_s27  ;;  %276 = vst [vmem:[#allocation4] sm:$0x1] (!%p623_p5), %v845_v2  ;;  %277 = vst [vmem:[#allocation5] sm:$0x1] (!%p623_p5), %v845_v2 }
  0x3b   : > { %s265_s20 = scalar_lea.vmem %s1074_s0, %s621_s4  ;;  %278 = vst [vmem:[#allocation6] sm:$0x1] (!%p623_p5), %v845_v2 }
  0x3f PF: > { %v985_v3 = vld [vmem:[%s226_s19] sm:$0xff]  ;;  %vm283_vm0 = vcmask 1042432   ;;  %v281_v7 = vld [vmem:[%s226_s19 + $0x8] sm:$0xf]  ;;  %v409_v10 = vlaneseq  ;;  %vm403_vm1 = vcmask 1046528   ;;  %vm417_vm2 = vcmask 1043456  }
  0x40   : > { %v425_v4 = vld [vmem:[#allocation2] sm:$0x1]  ;;  %v304_v13 = vrot.slane %v281_v7, 1  ;;  %v404_v16 = vrot.slane %v985_v3, 1  ;;  %v378_v45 = vrot.slane %v985_v3, 6  ;;  %p625_p6 = scmp.ne.s32.totalorder %s827_s17, 1 }
  0x41   : > { %v987_v5 = vld [vmem:[%s265_s20] sm:$0xff]  ;;  %v426_v6 = vadd.f32 %v425_v4, %v985_v3  ;;  %v410_v17 = vshrl.u32 %v409_v10, 7  ;;  %vm451_vm3 = vcmask (!%p625_p6), 1040384   ;;  %vm492_vm7 = vcmask (!%p625_p6), 24576  }
  0x42   : > { %v284_v8 = vsel %vm283_vm0, %v987_v5, -inf  ;;  %v344_v11 = vmul.f32 1.442695, %v987_v5  ;;  %v282_v14 = vld [vmem:[%s269_s1] sm:$0xf]  ;;  %v405_v20 = vsel %vm403_vm1, %v404_v16, %v304_v13  ;;  %v380_v53 = vsub.f32 %v985_v3, %v378_v45 }
  0x43   : > { %v285_v9 = vrot.slane %v284_v8, 4  ;;  %427 = vst [vmem:[#allocation2] sm:$0x1] %v426_v6  ;;  %v337_v19 = vrot.slane %v282_v14, 6  ;;  %v411_v21 = vsub.s32 0, %v410_v17  ;;  %v407_v22 = vsub.f32 %v987_v5, %v405_v20 }
  0x44   : > { %717 = vpow2.f32 %v344_v11  ;;  %v306_v55 = vsel %vm283_vm0, %v304_v13, 0.0  ;;  %v443_v59 = vld [vmem:[#allocation6] sm:$0x1]  ;;  %v624_v62 = vmul.f32 -1.442695, %v987_v5  ;;  %v382_v6 = vrot.slane %v380_v53, 1 }
  0x45   : > { %v286_v12 = vmax.f32 %v284_v8, %v285_v9  ;;  %v412_v24 = vrot.slane %v985_v3, %v411_v21  ;;  %v408_v25 = vmul.f32 %v407_v22, %v407_v22  ;;  %v339_v27 = vmul.f32 %v337_v19, %v987_v5 }
  0x46   : > { %v307_v4 = vrot.slane %v306_v55, 4  ;;  %v384_v19 = vmul.f32 %v382_v6, %v380_v53 }
  0x47   : > { %v287_v15 = vrot.slane %v286_v12, 2  ;;  %v413_v28 = vmul.f32 %v412_v24, %v408_v25  ;;  %v341_v33 = vrot.slane %v339_v27, 4 }
  0x49   : > { %v288_v18 = vmax.f32 %v286_v12, %v287_v15  ;;  %v415_v31 = vrot.slane %v413_v28, 4  ;;  %v343_v39 = vadd.f32 %v341_v33, %v282_v14 }
  0x4b   : > { %v289_v23 = vrot.slane %v288_v18, 1  ;;  %v418_v36 = vsel %vm417_vm2, %v415_v31, 0.0 }
  0x4c   : > { %v419_v38 = vrot.slane %v418_v36, 4 }
  0x4d   : > { %v290_v26 = vmax.f32 %v288_v18, %v289_v23 }
  0x4e   : > { %v718_v30 = vpop.eup %717  ;;  %v420_v41 = vadd.f32 %v419_v38, %v418_v36 }
  0x4f   : > { %v291_v29 = vsub.f32 %v987_v5, %v290_v26  ;;  %v347_v34 = vrot.slane %v718_v30, 4  ;;  %v308_v5 = vadd.f32 %v307_v4, %v306_v55 }
  0x50   : > { %v421_v44 = vrot.slane %v420_v41, 2 }
  0x51   : > { %v292_v32 = vmul.f32 1.442695, %v291_v29  ;;  %v314_v35 = vrot.slane %v291_v29, 7  ;;  %v349_v37 = vmul.f32 %v347_v34, %v282_v14  ;;  %v309_v24 = vrot.slane %v308_v5, 2 }
  0x52   : > { %v422_v48 = vadd.f32 %v421_v44, %v420_v41  ;;  %v398_v44 = vrot.slane %v985_v3, 5 }
  0x53   : > { %719 = vpow2.f32 %v292_v32  ;;  %v350_v40 = vmul.f32 0.5, %v349_v37  ;;  %v316_v42 = vmul.f32 %v314_v35, %v281_v7  ;;  %v310_v31 = vadd.f32 %v309_v24, %v308_v5 }
  0x54   : > { %v423_v52 = vrot.slane %v422_v48, 1  ;;  %721 = vpow2.f32 %v624_v62  ;;  %v450_v62 = vld [vmem:[#allocation2] sm:$0x1] (!%p625_p6) }
  0x55   : > { %v352_v43 = vrot.slane %v350_v40, 2  ;;  %v318_v49 = vrot.slane %v316_v42, 1  ;;  %v311_v36 = vrot.slane %v310_v31, 1 }
  0x56   : > { %v424_v58 = vadd.f32 %v423_v52, %v422_v48 }
  0x57   : > { %v354_v46 = vsub.f32 %v343_v39, %v352_v43  ;;  %v357_v47 = vadd.f32 %v352_v43, %v343_v39  ;;  %v320_v61 = vsel %vm283_vm0, %v318_v49, 0.0  ;;  %v312_v38 = vadd.f32 %v311_v36, %v310_v31 }
  0x58   : > { %v444_v7 = vadd.f32 %v443_v59, %v424_v58  ;;  %v321_v13 = vrot.slane %v320_v61, 4 }
  0x59   : > { %v355_v50 = vmax.f32 %v354_v46, 0.0  ;;  %v358_v51 = vmax.f32 %v357_v47, 0.0  ;;  %v428_v46 = vld [vmem:[#allocation3] sm:$0x1] }
  0x5a   : > { %445 = vst [vmem:[#allocation6] sm:$0x1] %v444_v7  ;;  %v322_v21 = vadd.f32 %v321_v13, %v320_v61 }
  0x5b   : > { %v356_v56 = vmin.f32 %v355_v50, 63.0  ;;  %v359_v57 = vmin.f32 %v358_v51, 63.0 }
  0x5c   : > { %v323_v28 = vrot.slane %v322_v21, 2 }
  0x5d   : > { %v720_v54 = vpop.eup %719  ;;  %v361_v0 = vrot.slane %v359_v57, 5  ;;  %v365_v1 = vrot.slane %v356_v56, 7  ;;  %v385_v2 = vsub.f32 %v359_v57, %v356_v56  ;;  %v431_v56 = vld [vmem:[#allocation4] sm:$0x1]  ;;  %v438_v57 = vld [vmem:[#allocation5] sm:$0x1] }
  0x5e   : > { %v294_v60 = vsel %vm283_vm0, %v720_v54, 0.0  ;;  %v722_v30 = vpop.eup %721  ;;  %v324_v33 = vadd.f32 %v323_v28, %v322_v21  ;;  %v439_v54 = vsub.f32 1.0, %v985_v3 }
  0x5f   : > { %v295_v63 = vrot.slane %v294_v60, 4  ;;  %v363_v9 = vmin.f32 %v985_v3, %v361_v0  ;;  %v367_v11 = vmax.f32 %v985_v3, %v365_v1  ;;  %v387_v12 = vrot.slane %v385_v2, 1 }
  0x60   : > { %v333_v34 = vadd.f32 1.0, %v722_v30  ;;  %v325_v37 = vrot.slane %v324_v33, 1  ;;  %v452_v0 = vsel (!%p625_p6), %vm451_vm3, %v450_v62, 0.0 }
  0x61   : > { %v296_v8 = vadd.f32 %v295_v63, %v294_v60  ;;  %v369_v15 = vrot.slane %v367_v11, 6  ;;  %v389_v16 = vmul.f32 %v387_v12, %v385_v2  ;;  %453 = vadd.xlane.f32.xlu0 (!%p625_p6), %v452_v0  ;;  %v475_v7 = vld [vmem:[#allocation6] sm:$0x1] (!%p625_p6) }
  0x62   : > { %v326_v41 = vadd.f32 %v325_v37, %v324_v33 }
  0x63   : > { %v297_v14 = vrot.slane %v296_v8, 2  ;;  %v371_v18 = vsub.f32 %v363_v9, %v369_v15  ;;  %v391_v20 = vrot.slane %v389_v16, 5 }
  0x65   : > { %v298_v17 = vadd.f32 %v297_v14, %v296_v8  ;;  %v372_v23 = vmax.f32 %v371_v18, 0.0  ;;  %v393_v27 = vadd.f32 %v391_v20, %v384_v19  ;;  %v476_v8 = vsel (!%p625_p6), %vm451_vm3, %v475_v7, 0.0 }
  0x67   : > { %v299_v22 = vrot.slane %v298_v17, 1  ;;  %v374_v26 = vrot.slane %v372_v23, 1 }
  0x69   : > { %v300_v25 = vadd.f32 %v299_v22, %v298_v17  ;;  %v376_v29 = vmul.f32 %v374_v26, %v372_v23  ;;  %v485_v17 = vand.u32 (!%p625_p6), 127, %v409_v10 }
  0x6b   : > { %723 = vlog2.f32 %v300_v25  ;;  %v394_v32 = vsub.f32 %v393_v27, %v376_v29  ;;  %vm488_vm4 = vcmp.eq.s32.totalorder (!%p625_p6), %v485_v17, 2  ;;  %vm487_vm5 = vcmp.eq.s32.totalorder (!%p625_p6), %v485_v17, 1 }
  0x6c   : > { %vm486_vm6 = vcmp.eq.s32.totalorder (!%p625_p6), %v485_v17, 0 }
  0x6d   : > { %v395_v35 = vadd.f32 1e-10, %v394_v32 }
  0x6f   : > { %725 = vrcp.f32 %v395_v35 }
  0x70   : > { %727 = vrcp.f32 %v333_v34 }
  0x75   : > { %v724_v39 = vpop.eup %723 }
  0x76   : > { %v302_v40 = vmul.f32 0.6931472, %v724_v39 }
  0x78   : > { %v327_v42 = vmul.f32 %v312_v38, %v302_v40 }
  0x79   : > { %v726_v45 = vpop.eup %725 }
  0x7a   : > { %v328_v43 = vsub.f32 %v327_v42, %v326_v41  ;;  %v397_v48 = vmul.f32 %v726_v45, %v376_v29  ;;  %v728_v49 = vpop.eup %727 }
  0x7c   : > { %v329_v47 = vmul.f32 %v328_v43, %v985_v3  ;;  %v400_v51 = vmul.f32 %v398_v44, %v397_v48 }
  0x7e   : > { %v429_v50 = vadd.f32 %v428_v46, %v329_v47  ;;  %v401_v52 = vsub.f32 %v400_v51, %v728_v49 }
  0x80   : > { %430 = vst [vmem:[#allocation3] sm:$0x1] %v429_v50  ;;  %v402_v53 = vmul.f32 %v401_v52, %v401_v52 }
  0x82   : > { %v433_v55 = vrot.slane %v402_v53, 3  ;;  %449 = sbr.rel (%p625_p6) target bundleno = 299 (0x12b), region = 78 }
  0x84   : > { %v435_v58 = vmul.f32 %v433_v55, %v985_v3  ;;  %v440_v59 = vmul.f32 %v439_v54, %v433_v55 }
  0x86   : > { %v436_v60 = vadd.f32 %v435_v58, %v431_v56  ;;  %v441_v61 = vadd.f32 %v440_v59, %v438_v57 }
  0x87   : > { %v455_v4 = vld [vmem:[#allocation3] sm:$0x1] (!%p625_p6) }
  0x88   : > { %437 = vst [vmem:[#allocation4] sm:$0x1] %v436_v60  ;;  %442 = vst [vmem:[#allocation5] sm:$0x1] %v441_v61  ;;  %v456_v3 = vsel (!%p625_p6), %vm451_vm3, %v455_v4, 0.0 }
  0x8f   : > { %v461_v63 = vld [vmem:[#allocation4] sm:$0x1]  ;;  %v467_v1 = vld [vmem:[#allocation5] sm:$0x1] }
  0x90   : > { %v468_v2 = vsel %vm451_vm3, %v467_v1, 0.0  ;;  %v462_v6 = vsel %vm451_vm3, %v461_v63, 0.0 }
  0x91   : > { %469 = vadd.xlane.f32.xlu1 %v468_v2  ;;  %463 = vadd.xlane.f32.xlu0 %v462_v6 }
  0x95   : > { %457 = vadd.xlane.f32.xlu1 %v456_v3  ;;  %477 = vadd.xlane.f32.xlu0 %v476_v8 }
  0xee   : > { %v454_v9 = vpop.xlane.xlu0 %453 }
  0xef   : > { %729 = vrcp.f32 %v454_v9  ;;  %v472_v11 = vsub.f32 256.0, %v454_v9 }
  0xf1   : > { %731 = vrcp.f32 %v472_v11 }
  0xf9   : > { %v730_v5 = vpop.eup %729 }
  0xfb   : > { %v732_v19 = vpop.eup %731 }
 0x11e   : > { %v464_v12 = vpop.xlane.xlu0 %463  ;;  %v470_v13 = vpop.xlane.xlu1 %469 }
 0x11f   : > { %v465_v15 = vmul.f32 3.75, %v464_v12  ;;  %v471_v16 = vmul.f32 100.0, %v470_v13 }
 0x121   : > { %v466_v21 = vmul.f32 %v730_v5, %v465_v15  ;;  %v474_v22 = vmul.f32 %v732_v19, %v471_v16 }
 0x122   : > { %v478_v14 = vpop.xlane.xlu0 %477  ;;  %v458_v20 = vpop.xlane.xlu1 %457 }
 0x123   : > { %v479_v18 = vmul.f32 6.0, %v478_v14  ;;  %v460_v24 = vmul.f32 %v730_v5, %v458_v20  ;;  %v481_v25 = vadd.f32 %v474_v22, %v466_v21 }
 0x125   : > { %v480_v23 = vmul.f32 %v730_v5, %v479_v18  ;;  %v482_v26 = vadd.f32 %v481_v25, %v460_v24 }
 0x127   : > { %v489_v27 = vsel %vm488_vm4, %v481_v25, %v480_v23  ;;  %v483_v28 = vadd.f32 %v482_v26, %v480_v23 }
 0x128   : > { %v490_v29 = vsel %vm487_vm5, %v460_v24, %v489_v27 }
 0x129   : > { %v491_v30 = vsel %vm486_vm6, %v483_v28, %v490_v29 }
 0x12a   : > { %493 = vst.msk [vmem:[%s982_s15] sm:$0x1] %vm492_vm7, %v491_v30 }
 0x12b PF: > { %s626_s1 = sshll.u32 %s831_s18, 4  ;;  %s507_s24 = sshll.u32 %s982_s15, 4  ;;  %s508_s24 = int_to_ptr.vmem [resolvable:$true] %s507_s24 }
 0x12c   : > { %s1018_s20 = scalar_lea.hbm %s1077_s3, %s626_s1  ;;  %s495_s25 = scalar_lea.sflag [#allocation9], %s256_s5 }
 0x12d   : > { %s733_s28 = scalar_lea.vmem %s508_s24, 16  ;;  %s846_s9 = smov [#allocation8]  }
 0x12e   : > { %p734_p8 = scmp.ne.s32.totalorder %s508_s24, %s733_s28  ;;  %s737_s10 = sshll.u32 %s846_s9, 4  ;;  %s738_s10 = int_to_ptr.vmem [resolvable:$false] %s737_s10 }
 0x12f   : > { %s739_s11 = scalar_lea.vmem %s738_s10, 32  ;;  %p740_p11 = scmp.lt.s32.totalorder %s508_s24, %s738_s10 }
 0x130   : > { %p735_p9 = pnand %p734_p8, %p939_p7  ;;  %p741_p13 = scmp.lt.s32.totalorder %s739_s11, %s733_s28 }
 0x132   : > { %p736_p10 = pneg %p735_p9  ;;  %p742_p0 = por %p741_p13, %p740_p11 }
 0x134   : > { %p743_p1 = pnand %p742_p0, %p736_p10 }
 0x136   : > { %746 = shalt.err (!%p743_p1)
}
 0x137   : > { %s747_s18 = scalar_lea.hbm %s1018_s20, 16  ;;  %s751_s23 = scalar_lea.hbm %s1077_s3, 32 }
 0x138   : > { %p748_p2 = scmp.ne.s32.totalorder %s1018_s20, %s747_s18  ;;  %p752_p5 = scmp.lt.u32.totalorder %s1018_s20, %s1077_s3 }
 0x139   : > { %p753_p6 = scmp.lt.u32.totalorder %s751_s23, %s747_s18  ;;  %p755_p9 = scmp.lt.u32.totalorder %s747_s18, %s1018_s20 }
 0x13a   : > { %p749_p3 = pnand %p748_p2, %p939_p7 }
 0x13b   : > { %p754_p8 = por %p753_p6, %p752_p5 }
 0x13c   : > { %p750_p4 = pneg %p749_p3 }
 0x13d   : > { %p756_p10 = por %p755_p9, %p754_p8 }
 0x13f   : > { %p757_p11 = pnand %p756_p10, %p750_p4 }
 0x141   : > { %760 = shalt.err (!%p757_p11)
}
 0x142   : > { %629 = dma.vmem_to_hbm [thread:$0]  (%p939_p7), %s508_s24, 16, %s1018_s20, %s495_s25  }
 0x143 PF: > { %p635_p13 = scmp.ge.s32.totalorder %s843_s21, 2  ;;  %s519_s29 = sand.u32 1, %s807_s12  }
 0x144   : > { %s520_s26 = scalar_lea.sflag [#allocation9], %s519_s29 }
 0x145   : > { %p632_p0 = pnand %p635_p13, %p947_p12 }
 0x147   : > { %802 = dma.done.wait (!%p632_p0), %s520_s26, 16  }
 0x148   : > { %804 = vsyncadd (!%p632_p0), %s520_s26, 4294967280  ;;  %s16_s21 = sadd.s32 1, %s843_s21   ;;  %s1091_s17 = sld [smem:[#allocation11_spill]] }
 0x149   : > { %p13_p1 = scmp.ge.s32.totalorder %s16_s21, 6   ;;  %s1092_s18 = sld [smem:[#allocation12_spill]] }
 0x14a   : > { %s1093_s19 = sld [smem:[#allocation13_spill]]  ;;  %s1094_s20 = sld [smem:[#allocation14_spill]] }
 0x14b   : > { %s1095_s12 = smov %s811_s13  ;;  %s1096_s13 = smov %s815_s14 }
 0x14c   : > { %s1097_s14 = smov %s952_s7  ;;  %s1098_s15 = smov %s823_s16 }
 0x14d   : > { %s1099_s16 = smov %s955_s8  ;;  %15 = sbr.rel (!%p13_p1) target bundleno = 8 (0x8), region = 124 }
 0x154   :  { %524 = vsyncpa [#allocation9], 1 }
 0x155   :  { %526 = vsyncpa [#allocation9 + $0x1], 1 }

</bundles_post_ra>
